<compile_context>
chip_gen: v7x
topology: tpu7x:2x2x1
jax: 0.10.0
libtpu: 0.0.40
codegen_flags: <defaults>
</compile_context>

<pallas_src>
import functools

import jax
import jax.numpy as jnp
from jax.experimental import pallas as pl
from jax.experimental.pallas import tpu as pltpu

EPS = 1e-12  # matches torch.nn.functional.normalize default eps


def _l2norm(v, axis):
    # F.normalize: v / max(||v||_2, eps)  ==  v * rsqrt(max(||v||^2, eps^2))
    s = jnp.sum(v * v, axis=axis, keepdims=True)
    return v * jax.lax.rsqrt(jnp.maximum(s, EPS * EPS))


def _make_routing_kernel(m, k, max_iter):
    inv_k = 1.0 / float(k)

    def kernel(z_ref, x_ref, u_ref):
        # z_ref: (m, k, nh, tn) bf16  normalized neighbor features (zero rows = padding)
        # x_ref: (k, nh, tn)    bf16  normalized node features
        # u_ref: (k, nh, tn)          routed output (caller dtype)
        xk = x_ref[...].astype(jnp.float32)

        # Iteration 0: routing logits are all zero -> softmax over the k capsules
        # is exactly uniform 1/k; skip the softmax pass entirely.  Accumulate one
        # neighbor at a time so no (m,k,nh,tn) temporary is materialized.
        zsum = z_ref[0].astype(jnp.float32)
        for j in range(1, m):                                   # static unroll, m small
            zsum = zsum + z_ref[j].astype(jnp.float32)
        u = zsum * inv_k + xk                                   # (k, nh, tn)

        for _ in range(1, max_iter):                            # static unroll
            u = _l2norm(u, axis=1)                              # normalize over nh
            acc = xk                                            # residual term
            # Per-neighbor loop: peak live data is a couple of (k,nh,tn) f32
            # tiles instead of full-size z*u / z*w products.
            for j in range(m):
                zj = z_ref[j].astype(jnp.float32)               # (k, nh, tn)
                # agreement logits over the nh hidden dims
                p = jnp.sum(zj * u, axis=1, keepdims=True)      # (k, 1, tn)
                # softmax over the k capsules; |p| <= 1 (unit-norm operands),
                # so no max-shift needed (mathematically identical).
                e = jnp.exp(p)
                w = e * pl.reciprocal(jnp.sum(e, axis=0, keepdims=True),
                                      approx=True)              # (k, 1, tn)
                acc = acc + zj * w                              # (k, nh, tn)
            u = acc

        u_ref[...] = u.astype(u_ref.dtype)

    return kernel


def _round_up(v, mult):
    return (v + mult - 1) // mult * mult


def _vmem_limit_bytes():
    phys = 64 * 1024 * 1024  # conservative default: v7x per-TC physical VMEM
    try:
        info = pltpu.get_tpu_info()
        phys = int(getattr(info, "vmem_capacity_bytes", phys)) or phys
    except Exception:
        pass
    # ~75% of physical, capped at 96 MiB (plenty on v5e/v6e, safe on v7x).
    return min(phys * 3 // 4, 96 * 1024 * 1024)


def _choose_tile_n(n_pad, m, d, out_bytes, vmem_limit_bytes, max_tile=4096):
    """Pick the lane tile width from the actual VMEM limit."""
    budget = int(vmem_limit_bytes * 0.7)
    # Per lane-column bytes:
    #   pipelined (double-buffered): z bf16 2*(m*d*2), x bf16 2*(d*2), u 2*(d*out_bytes)
    #   in-kernel f32 temporaries:   ~5 * d * 4  (u, acc, xk, zj + slack for p/e/w)
    per_col = 2 * (2 * m * d + 2 * d + out_bytes * d) + 5 * 4 * d
    tn = (budget // per_col) // 128 * 128
    tn = max(128, min(tn, max_tile))
    # Keep at least 2 grid steps when possible so v7x's two TensorCores both work.
    if n_pad >= 256:
        tn = min(tn, (n_pad // 2) // 128 * 128)
    tn = min(tn, n_pad)
    while n_pad % tn:
        tn -= 128
    return tn


@functools.partial(jax.jit, static_argnames=("num_caps", "max_iter", "tile_n"))
def routing_layer_forward(x, neighbors, *, num_caps, max_iter, tile_n=None):
    """JAX/Pallas equivalent of RoutingLayer(dim=d, num_caps).forward(x, neighbors, max_iter)."""
    n, d = x.shape
    k = num_caps
    assert d % k == 0
    nh = d // k
    assert neighbors.shape[0] % n == 0
    m = neighbors.shape[0] // n
    out_dtype = x.dtype
    out_bytes = jnp.dtype(out_dtype).itemsize

    # ---- glue (plain JAX) ----
    # Per-capsule L2 normalize ONCE, before the gather (matches PyTorch order).
    xk = _l2norm(x.astype(jnp.float32).reshape(n, k, nh), axis=2)          # (n, k, nh) f32

    # Transpose the SMALL (n+1, d) source once (node dim -> lanes), bf16 for HBM.
    x_src = jnp.concatenate([xk.reshape(n, d), jnp.zeros((1, d), jnp.float32)], axis=0)
    x_src_T = x_src.T.astype(jnp.bfloat16)                                  # (d, n+1)

    # Pad node dim to a multiple of 128; padded nodes index the zero column.
    n_pad = _round_up(n, 128)
    nb = neighbors.reshape(n, m).astype(jnp.int32)
    if n_pad > n:
        nb = jnp.concatenate([nb, jnp.full((n_pad - n, m), n, jnp.int32)], axis=0)

    # x in kernel layout (k, nh, n_pad), bf16, reusing the already-transposed source.
    if n_pad > n:
        x_t = jnp.concatenate(
            [x_src_T[:, :n], jnp.zeros((d, n_pad - n), jnp.bfloat16)], axis=1)
    else:
        x_t = x_src_T[:, :n]
    x_t = x_t.reshape(k, nh, n_pad)

    # Transpose-free gather: single batched gather along the node (lane) axis of
    # the small transposed source; output comes out directly as (m, d, n_pad),
    # so no extra HBM read+write of the big z array.
    z_t = jax.vmap(lambda idx: jnp.take(x_src_T, idx, axis=1))(nb.T)        # (m, d, n_pad)
    z_t = z_t.reshape(m, k, nh, n_pad)                                      # free reshape

    vmem_limit = _vmem_limit_bytes()
    tn = _choose_tile_n(n_pad, m, d, out_bytes, vmem_limit) if tile_n is None else tile_n
    assert n_pad % tn == 0 and tn % 128 == 0

    # Advisory cost estimate so XLA can schedule the gather glue around the kernel.
    flops = int(n_pad * ((m + 2) * d + (max_iter - 1) * (3 * d + m * (4 * d + 3 * k))))
    transcendentals = int(n_pad * (max_iter - 1) * (m * k + m + k))
    bytes_accessed = int(z_t.size * 2 + x_t.size * 2 + d * n_pad * out_bytes)

    kern = _make_routing_kernel(m, k, max_iter)
    u_t = pl.pallas_call(
        kern,
        out_shape=jax.ShapeDtypeStruct((k, nh, n_pad), out_dtype),
        grid_spec=pltpu.PrefetchScalarGridSpec(
            num_scalar_prefetch=0,
            grid=(n_pad // tn,),
            in_specs=[
                pl.BlockSpec((m, k, nh, tn), lambda i: (0, 0, 0, i)),
                pl.BlockSpec((k, nh, tn), lambda i: (0, 0, i)),
            ],
            out_specs=pl.BlockSpec((k, nh, tn), lambda i: (0, 0, i)),
        ),
        compiler_params=pltpu.CompilerParams(
            dimension_semantics=("parallel",),
            vmem_limit_bytes=int(vmem_limit),
        ),
        cost_estimate=pl.CostEstimate(
            flops=flops,
            transcendentals=transcendentals,
            bytes_accessed=bytes_accessed,
        ),
    )(z_t, x_t)

    u = jnp.transpose(u_t, (2, 0, 1))[:n].reshape(n, d)
    return u.astype(x.dtype)


def routing_layer_ref(x, neighbors, num_caps, max_iter):
    """Pure-JAX f32 reference mirroring the PyTorch forward exactly."""
    n, d = x.shape
    k = num_caps
    nh = d // k
    m = neighbors.shape[0] // n
    xk = x.reshape(n, k, nh)
    xk = xk / jnp.maximum(jnp.linalg.norm(xk, axis=2, keepdims=True), EPS)
    xn = xk.reshape(n, d)
    z_pad = jnp.concatenate([xn, jnp.zeros((1, d), x.dtype)], axis=0)
    z = z_pad[neighbors].reshape(n, m, k, nh)
    u = None
    for it in range(max_iter):
        if u is None:
            p = jnp.zeros((n, m, k), x.dtype)
        else:
            p = jnp.sum(z * u.reshape(n, 1, k, nh), axis=3)
        p = jax.nn.softmax(p, axis=2)
        u = jnp.sum(z * p[..., None], axis=1) + xk
        if it < max_iter - 1:
            u = u / jnp.maximum(jnp.linalg.norm(u, axis=2, keepdims=True), EPS)
    return u.reshape(n, d)


if __name__ == "__main__":
    # Small shapes implied by the forward: x (n, d), neighbors (n*m,), d % num_caps == 0.
    n, d, num_caps, m, max_iter = 16, 32, 4, 4, 3

    key = jax.random.PRNGKey(0)
    kx, kn = jax.random.split(key)
    x = jax.random.normal(kx, (n, d), dtype=jnp.float32)
    # neighbor indices in [0, n]; index n selects the zero-padding row
    neighbors = jax.random.randint(kn, (n * m,), 0, n + 1, dtype=jnp.int32)

    out = routing_layer_forward(x, neighbors, num_caps=num_caps, max_iter=max_iter)
    out = jax.block_until_ready(out)

    ref = routing_layer_ref(x, neighbors, num_caps, max_iter)
    assert out.shape == (n, d)
    # bf16 z/x storage + approx reciprocal trade ~1e-3 relative error for ~2x
    # HBM traffic reduction; tolerance loosened accordingly.
    assert jnp.allclose(out, ref, atol=2e-2, rtol=2e-2), "mismatch vs JAX reference"
    print("KERNEL_OK")
</pallas_src>

<mosaic_0001>
module attributes {stable_mosaic.version = 11 : i64} {
  func.func @kernel(%arg0: i32, %arg1: memref<4x4x8x128xbf16, #tpu.memory_space<vmem>>, %arg2: memref<4x8x128xbf16, #tpu.memory_space<vmem>>, %arg3: memref<4x8x128xf32, #tpu.memory_space<vmem>>) attributes {dimension_semantics = [#tpu.dimension_semantics<parallel>], iteration_bounds = array<i64: 1>, scalar_prefetch = 0 : i64, scratch_operands = 0 : i64, tpu.core_type = #tpu.core_type<tc>, window_params = [{transform_indices = @transform_0, window_bounds = array<i64: 4, 4, 8, 128>}, {transform_indices = @transform_1, window_bounds = array<i64: 4, 8, 128>}, {transform_indices = @transform_2, window_bounds = array<i64: 4, 8, 128>}]} {
    %c0 = arith.constant 0 : index
    %c0_0 = arith.constant 0 : index
    %c0_1 = arith.constant 0 : index
    %0 = vector.load %arg2[%c0, %c0_0, %c0_1] : memref<4x8x128xbf16, #tpu.memory_space<vmem>>, vector<4x8x128xbf16>
    %1 = arith.extf %0 : vector<4x8x128xbf16> to vector<4x8x128xf32>
    %c0_2 = arith.constant 0 : index
    %c0_3 = arith.constant 0 : index
    %c0_4 = arith.constant 0 : index
    %c0_5 = arith.constant 0 : index
    %2 = vector.load %arg1[%c0_2, %c0_3, %c0_4, %c0_5] : memref<4x4x8x128xbf16, #tpu.memory_space<vmem>>, vector<1x4x8x128xbf16>
    %3 = vector.shape_cast %2 : vector<1x4x8x128xbf16> to vector<4x8x128xbf16>
    %4 = arith.extf %3 : vector<4x8x128xbf16> to vector<4x8x128xf32>
    %c1 = arith.constant 1 : index
    %c0_6 = arith.constant 0 : index
    %c0_7 = arith.constant 0 : index
    %c0_8 = arith.constant 0 : index
    %5 = vector.load %arg1[%c1, %c0_6, %c0_7, %c0_8] : memref<4x4x8x128xbf16, #tpu.memory_space<vmem>>, vector<1x4x8x128xbf16>
    %6 = vector.shape_cast %5 : vector<1x4x8x128xbf16> to vector<4x8x128xbf16>
    %7 = arith.extf %6 : vector<4x8x128xbf16> to vector<4x8x128xf32>
    %8 = arith.addf %4, %7 : vector<4x8x128xf32>
    %c2 = arith.constant 2 : index
    %c0_9 = arith.constant 0 : index
    %c0_10 = arith.constant 0 : index
    %c0_11 = arith.constant 0 : index
    %9 = vector.load %arg1[%c2, %c0_9, %c0_10, %c0_11] : memref<4x4x8x128xbf16, #tpu.memory_space<vmem>>, vector<1x4x8x128xbf16>
    %10 = vector.shape_cast %9 : vector<1x4x8x128xbf16> to vector<4x8x128xbf16>
    %11 = arith.extf %10 : vector<4x8x128xbf16> to vector<4x8x128xf32>
    %12 = arith.addf %8, %11 : vector<4x8x128xf32>
    %c3 = arith.constant 3 : index
    %c0_12 = arith.constant 0 : index
    %c0_13 = arith.constant 0 : index
    %c0_14 = arith.constant 0 : index
    %13 = vector.load %arg1[%c3, %c0_12, %c0_13, %c0_14] : memref<4x4x8x128xbf16, #tpu.memory_space<vmem>>, vector<1x4x8x128xbf16>
    %14 = vector.shape_cast %13 : vector<1x4x8x128xbf16> to vector<4x8x128xbf16>
    %15 = arith.extf %14 : vector<4x8x128xbf16> to vector<4x8x128xf32>
    %16 = arith.addf %12, %15 : vector<4x8x128xf32>
    %cst = arith.constant 2.500000e-01 : f32
    %17 = vector.broadcast %cst : f32 to vector<4x8x128xf32>
    %18 = arith.mulf %16, %17 : vector<4x8x128xf32>
    %19 = arith.addf %18, %1 : vector<4x8x128xf32>
    %20 = arith.mulf %19, %19 : vector<4x8x128xf32>
    %cst_15 = arith.constant dense<0.000000e+00> : vector<4x128xf32>
    %21 = vector.multi_reduction <add>, %20, %cst_15 [1] : vector<4x8x128xf32> to vector<4x128xf32>
    %22 = vector.shape_cast %21 : vector<4x128xf32> to vector<4x1x128xf32>
    %cst_16 = arith.constant 1.000000e-24 : f32
    %23 = vector.broadcast %cst_16 : f32 to vector<4x1x128xf32>
    %24 = arith.maximumf %22, %23 : vector<4x1x128xf32>
    %25 = math.rsqrt %24 : vector<4x1x128xf32>
    %26 = vector.broadcast %25 : vector<4x1x128xf32> to vector<4x8x128xf32>
    %27 = arith.mulf %19, %26 : vector<4x8x128xf32>
    %c0_17 = arith.constant 0 : index
    %c0_18 = arith.constant 0 : index
    %c0_19 = arith.constant 0 : index
    %c0_20 = arith.constant 0 : index
    %28 = vector.load %arg1[%c0_17, %c0_18, %c0_19, %c0_20] : memref<4x4x8x128xbf16, #tpu.memory_space<vmem>>, vector<1x4x8x128xbf16>
    %29 = vector.shape_cast %28 : vector<1x4x8x128xbf16> to vector<4x8x128xbf16>
    %30 = arith.extf %29 : vector<4x8x128xbf16> to vector<4x8x128xf32>
    %31 = arith.mulf %30, %27 : vector<4x8x128xf32>
    %cst_21 = arith.constant dense<0.000000e+00> : vector<4x128xf32>
    %32 = vector.multi_reduction <add>, %31, %cst_21 [1] : vector<4x8x128xf32> to vector<4x128xf32>
    %33 = vector.shape_cast %32 : vector<4x128xf32> to vector<4x1x128xf32>
    %34 = math.exp %33 : vector<4x1x128xf32>
    %cst_22 = arith.constant dense<0.000000e+00> : vector<1x128xf32>
    %35 = vector.multi_reduction <add>, %34, %cst_22 [0] : vector<4x1x128xf32> to vector<1x128xf32>
    %36 = vector.shape_cast %35 : vector<1x128xf32> to vector<1x1x128xf32>
    %37 = tpu.reciprocal %36 {approx = true} : vector<1x1x128xf32> -> vector<1x1x128xf32>
    %38 = vector.broadcast %37 : vector<1x1x128xf32> to vector<4x1x128xf32>
    %39 = arith.mulf %34, %38 : vector<4x1x128xf32>
    %40 = vector.broadcast %39 : vector<4x1x128xf32> to vector<4x8x128xf32>
    %41 = arith.mulf %30, %40 : vector<4x8x128xf32>
    %42 = arith.addf %1, %41 : vector<4x8x128xf32>
    %c1_23 = arith.constant 1 : index
    %c0_24 = arith.constant 0 : index
    %c0_25 = arith.constant 0 : index
    %c0_26 = arith.constant 0 : index
    %43 = vector.load %arg1[%c1_23, %c0_24, %c0_25, %c0_26] : memref<4x4x8x128xbf16, #tpu.memory_space<vmem>>, vector<1x4x8x128xbf16>
    %44 = vector.shape_cast %43 : vector<1x4x8x128xbf16> to vector<4x8x128xbf16>
    %45 = arith.extf %44 : vector<4x8x128xbf16> to vector<4x8x128xf32>
    %46 = arith.mulf %45, %27 : vector<4x8x128xf32>
    %cst_27 = arith.constant dense<0.000000e+00> : vector<4x128xf32>
    %47 = vector.multi_reduction <add>, %46, %cst_27 [1] : vector<4x8x128xf32> to vector<4x128xf32>
    %48 = vector.shape_cast %47 : vector<4x128xf32> to vector<4x1x128xf32>
    %49 = math.exp %48 : vector<4x1x128xf32>
    %cst_28 = arith.constant dense<0.000000e+00> : vector<1x128xf32>
    %50 = vector.multi_reduction <add>, %49, %cst_28 [0] : vector<4x1x128xf32> to vector<1x128xf32>
    %51 = vector.shape_cast %50 : vector<1x128xf32> to vector<1x1x128xf32>
    %52 = tpu.reciprocal %51 {approx = true} : vector<1x1x128xf32> -> vector<1x1x128xf32>
    %53 = vector.broadcast %52 : vector<1x1x128xf32> to vector<4x1x128xf32>
    %54 = arith.mulf %49, %53 : vector<4x1x128xf32>
    %55 = vector.broadcast %54 : vector<4x1x128xf32> to vector<4x8x128xf32>
    %56 = arith.mulf %45, %55 : vector<4x8x128xf32>
    %57 = arith.addf %42, %56 : vector<4x8x128xf32>
    %c2_29 = arith.constant 2 : index
    %c0_30 = arith.constant 0 : index
    %c0_31 = arith.constant 0 : index
    %c0_32 = arith.constant 0 : index
    %58 = vector.load %arg1[%c2_29, %c0_30, %c0_31, %c0_32] : memref<4x4x8x128xbf16, #tpu.memory_space<vmem>>, vector<1x4x8x128xbf16>
    %59 = vector.shape_cast %58 : vector<1x4x8x128xbf16> to vector<4x8x128xbf16>
    %60 = arith.extf %59 : vector<4x8x128xbf16> to vector<4x8x128xf32>
    %61 = arith.mulf %60, %27 : vector<4x8x128xf32>
    %cst_33 = arith.constant dense<0.000000e+00> : vector<4x128xf32>
    %62 = vector.multi_reduction <add>, %61, %cst_33 [1] : vector<4x8x128xf32> to vector<4x128xf32>
    %63 = vector.shape_cast %62 : vector<4x128xf32> to vector<4x1x128xf32>
    %64 = math.exp %63 : vector<4x1x128xf32>
    %cst_34 = arith.constant dense<0.000000e+00> : vector<1x128xf32>
    %65 = vector.multi_reduction <add>, %64, %cst_34 [0] : vector<4x1x128xf32> to vector<1x128xf32>
    %66 = vector.shape_cast %65 : vector<1x128xf32> to vector<1x1x128xf32>
    %67 = tpu.reciprocal %66 {approx = true} : vector<1x1x128xf32> -> vector<1x1x128xf32>
    %68 = vector.broadcast %67 : vector<1x1x128xf32> to vector<4x1x128xf32>
    %69 = arith.mulf %64, %68 : vector<4x1x128xf32>
    %70 = vector.broadcast %69 : vector<4x1x128xf32> to vector<4x8x128xf32>
    %71 = arith.mulf %60, %70 : vector<4x8x128xf32>
    %72 = arith.addf %57, %71 : vector<4x8x128xf32>
    %c3_35 = arith.constant 3 : index
    %c0_36 = arith.constant 0 : index
    %c0_37 = arith.constant 0 : index
    %c0_38 = arith.constant 0 : index
    %73 = vector.load %arg1[%c3_35, %c0_36, %c0_37, %c0_38] : memref<4x4x8x128xbf16, #tpu.memory_space<vmem>>, vector<1x4x8x128xbf16>
    %74 = vector.shape_cast %73 : vector<1x4x8x128xbf16> to vector<4x8x128xbf16>
    %75 = arith.extf %74 : vector<4x8x128xbf16> to vector<4x8x128xf32>
    %76 = arith.mulf %75, %27 : vector<4x8x128xf32>
    %cst_39 = arith.constant dense<0.000000e+00> : vector<4x128xf32>
    %77 = vector.multi_reduction <add>, %76, %cst_39 [1] : vector<4x8x128xf32> to vector<4x128xf32>
    %78 = vector.shape_cast %77 : vector<4x128xf32> to vector<4x1x128xf32>
    %79 = math.exp %78 : vector<4x1x128xf32>
    %cst_40 = arith.constant dense<0.000000e+00> : vector<1x128xf32>
    %80 = vector.multi_reduction <add>, %79, %cst_40 [0] : vector<4x1x128xf32> to vector<1x128xf32>
    %81 = vector.shape_cast %80 : vector<1x128xf32> to vector<1x1x128xf32>
    %82 = tpu.reciprocal %81 {approx = true} : vector<1x1x128xf32> -> vector<1x1x128xf32>
    %83 = vector.broadcast %82 : vector<1x1x128xf32> to vector<4x1x128xf32>
    %84 = arith.mulf %79, %83 : vector<4x1x128xf32>
    %85 = vector.broadcast %84 : vector<4x1x128xf32> to vector<4x8x128xf32>
    %86 = arith.mulf %75, %85 : vector<4x8x128xf32>
    %87 = arith.addf %72, %86 : vector<4x8x128xf32>
    %88 = arith.mulf %87, %87 : vector<4x8x128xf32>
    %cst_41 = arith.constant dense<0.000000e+00> : vector<4x128xf32>
    %89 = vector.multi_reduction <add>, %88, %cst_41 [1] : vector<4x8x128xf32> to vector<4x128xf32>
    %90 = vector.shape_cast %89 : vector<4x128xf32> to vector<4x1x128xf32>
    %cst_42 = arith.constant 1.000000e-24 : f32
    %91 = vector.broadcast %cst_42 : f32 to vector<4x1x128xf32>
    %92 = arith.maximumf %90, %91 : vector<4x1x128xf32>
    %93 = math.rsqrt %92 : vector<4x1x128xf32>
    %94 = vector.broadcast %93 : vector<4x1x128xf32> to vector<4x8x128xf32>
    %95 = arith.mulf %87, %94 : vector<4x8x128xf32>
    %c0_43 = arith.constant 0 : index
    %c0_44 = arith.constant 0 : index
    %c0_45 = arith.constant 0 : index
    %c0_46 = arith.constant 0 : index
    %96 = vector.load %arg1[%c0_43, %c0_44, %c0_45, %c0_46] : memref<4x4x8x128xbf16, #tpu.memory_space<vmem>>, vector<1x4x8x128xbf16>
    %97 = vector.shape_cast %96 : vector<1x4x8x128xbf16> to vector<4x8x128xbf16>
    %98 = arith.extf %97 : vector<4x8x128xbf16> to vector<4x8x128xf32>
    %99 = arith.mulf %98, %95 : vector<4x8x128xf32>
    %cst_47 = arith.constant dense<0.000000e+00> : vector<4x128xf32>
    %100 = vector.multi_reduction <add>, %99, %cst_47 [1] : vector<4x8x128xf32> to vector<4x128xf32>
    %101 = vector.shape_cast %100 : vector<4x128xf32> to vector<4x1x128xf32>
    %102 = math.exp %101 : vector<4x1x128xf32>
    %cst_48 = arith.constant dense<0.000000e+00> : vector<1x128xf32>
    %103 = vector.multi_reduction <add>, %102, %cst_48 [0] : vector<4x1x128xf32> to vector<1x128xf32>
    %104 = vector.shape_cast %103 : vector<1x128xf32> to vector<1x1x128xf32>
    %105 = tpu.reciprocal %104 {approx = true} : vector<1x1x128xf32> -> vector<1x1x128xf32>
    %106 = vector.broadcast %105 : vector<1x1x128xf32> to vector<4x1x128xf32>
    %107 = arith.mulf %102, %106 : vector<4x1x128xf32>
    %108 = vector.broadcast %107 : vector<4x1x128xf32> to vector<4x8x128xf32>
    %109 = arith.mulf %98, %108 : vector<4x8x128xf32>
    %110 = arith.addf %1, %109 : vector<4x8x128xf32>
    %c1_49 = arith.constant 1 : index
    %c0_50 = arith.constant 0 : index
    %c0_51 = arith.constant 0 : index
    %c0_52 = arith.constant 0 : index
    %111 = vector.load %arg1[%c1_49, %c0_50, %c0_51, %c0_52] : memref<4x4x8x128xbf16, #tpu.memory_space<vmem>>, vector<1x4x8x128xbf16>
    %112 = vector.shape_cast %111 : vector<1x4x8x128xbf16> to vector<4x8x128xbf16>
    %113 = arith.extf %112 : vector<4x8x128xbf16> to vector<4x8x128xf32>
    %114 = arith.mulf %113, %95 : vector<4x8x128xf32>
    %cst_53 = arith.constant dense<0.000000e+00> : vector<4x128xf32>
    %115 = vector.multi_reduction <add>, %114, %cst_53 [1] : vector<4x8x128xf32> to vector<4x128xf32>
    %116 = vector.shape_cast %115 : vector<4x128xf32> to vector<4x1x128xf32>
    %117 = math.exp %116 : vector<4x1x128xf32>
    %cst_54 = arith.constant dense<0.000000e+00> : vector<1x128xf32>
    %118 = vector.multi_reduction <add>, %117, %cst_54 [0] : vector<4x1x128xf32> to vector<1x128xf32>
    %119 = vector.shape_cast %118 : vector<1x128xf32> to vector<1x1x128xf32>
    %120 = tpu.reciprocal %119 {approx = true} : vector<1x1x128xf32> -> vector<1x1x128xf32>
    %121 = vector.broadcast %120 : vector<1x1x128xf32> to vector<4x1x128xf32>
    %122 = arith.mulf %117, %121 : vector<4x1x128xf32>
    %123 = vector.broadcast %122 : vector<4x1x128xf32> to vector<4x8x128xf32>
    %124 = arith.mulf %113, %123 : vector<4x8x128xf32>
    %125 = arith.addf %110, %124 : vector<4x8x128xf32>
    %c2_55 = arith.constant 2 : index
    %c0_56 = arith.constant 0 : index
    %c0_57 = arith.constant 0 : index
    %c0_58 = arith.constant 0 : index
    %126 = vector.load %arg1[%c2_55, %c0_56, %c0_57, %c0_58] : memref<4x4x8x128xbf16, #tpu.memory_space<vmem>>, vector<1x4x8x128xbf16>
    %127 = vector.shape_cast %126 : vector<1x4x8x128xbf16> to vector<4x8x128xbf16>
    %128 = arith.extf %127 : vector<4x8x128xbf16> to vector<4x8x128xf32>
    %129 = arith.mulf %128, %95 : vector<4x8x128xf32>
    %cst_59 = arith.constant dense<0.000000e+00> : vector<4x128xf32>
    %130 = vector.multi_reduction <add>, %129, %cst_59 [1] : vector<4x8x128xf32> to vector<4x128xf32>
    %131 = vector.shape_cast %130 : vector<4x128xf32> to vector<4x1x128xf32>
    %132 = math.exp %131 : vector<4x1x128xf32>
    %cst_60 = arith.constant dense<0.000000e+00> : vector<1x128xf32>
    %133 = vector.multi_reduction <add>, %132, %cst_60 [0] : vector<4x1x128xf32> to vector<1x128xf32>
    %134 = vector.shape_cast %133 : vector<1x128xf32> to vector<1x1x128xf32>
    %135 = tpu.reciprocal %134 {approx = true} : vector<1x1x128xf32> -> vector<1x1x128xf32>
    %136 = vector.broadcast %135 : vector<1x1x128xf32> to vector<4x1x128xf32>
    %137 = arith.mulf %132, %136 : vector<4x1x128xf32>
    %138 = vector.broadcast %137 : vector<4x1x128xf32> to vector<4x8x128xf32>
    %139 = arith.mulf %128, %138 : vector<4x8x128xf32>
    %140 = arith.addf %125, %139 : vector<4x8x128xf32>
    %c3_61 = arith.constant 3 : index
    %c0_62 = arith.constant 0 : index
    %c0_63 = arith.constant 0 : index
    %c0_64 = arith.constant 0 : index
    %141 = vector.load %arg1[%c3_61, %c0_62, %c0_63, %c0_64] : memref<4x4x8x128xbf16, #tpu.memory_space<vmem>>, vector<1x4x8x128xbf16>
    %142 = vector.shape_cast %141 : vector<1x4x8x128xbf16> to vector<4x8x128xbf16>
    %143 = arith.extf %142 : vector<4x8x128xbf16> to vector<4x8x128xf32>
    %144 = arith.mulf %143, %95 : vector<4x8x128xf32>
    %cst_65 = arith.constant dense<0.000000e+00> : vector<4x128xf32>
    %145 = vector.multi_reduction <add>, %144, %cst_65 [1] : vector<4x8x128xf32> to vector<4x128xf32>
    %146 = vector.shape_cast %145 : vector<4x128xf32> to vector<4x1x128xf32>
    %147 = math.exp %146 : vector<4x1x128xf32>
    %cst_66 = arith.constant dense<0.000000e+00> : vector<1x128xf32>
    %148 = vector.multi_reduction <add>, %147, %cst_66 [0] : vector<4x1x128xf32> to vector<1x128xf32>
    %149 = vector.shape_cast %148 : vector<1x128xf32> to vector<1x1x128xf32>
    %150 = tpu.reciprocal %149 {approx = true} : vector<1x1x128xf32> -> vector<1x1x128xf32>
    %151 = vector.broadcast %150 : vector<1x1x128xf32> to vector<4x1x128xf32>
    %152 = arith.mulf %147, %151 : vector<4x1x128xf32>
    %153 = vector.broadcast %152 : vector<4x1x128xf32> to vector<4x8x128xf32>
    %154 = arith.mulf %143, %153 : vector<4x8x128xf32>
    %155 = arith.addf %140, %154 : vector<4x8x128xf32>
    %c0_67 = arith.constant 0 : index
    %c0_68 = arith.constant 0 : index
    %c0_69 = arith.constant 0 : index
    %156 = vector.load %arg3[%c0_67, %c0_68, %c0_69] : memref<4x8x128xf32, #tpu.memory_space<vmem>>, vector<4x8x128xf32>
    tpu.vector_store %arg3[%c0_67, %c0_68, %c0_69], %155 {strides = array<i32>} : memref<4x8x128xf32, #tpu.memory_space<vmem>>, vector<4x8x128xf32>,
    return
  }
  func.func @transform_0(%arg0: i32) -> (i32, i32, i32, i32) {
    %c0_i32 = arith.constant 0 : i32
    %c0_i32_0 = arith.constant 0 : i32
    %c0_i32_1 = arith.constant 0 : i32
    %c0_i32_2 = arith.constant 0 : i32
    return %c0_i32, %c0_i32_0, %c0_i32_1, %arg0 : i32, i32, i32, i32
  }
  func.func @transform_1(%arg0: i32) -> (i32, i32, i32) {
    %c0_i32 = arith.constant 0 : i32
    %c0_i32_0 = arith.constant 0 : i32
    %c0_i32_1 = arith.constant 0 : i32
    return %c0_i32, %c0_i32_0, %arg0 : i32, i32, i32
  }
  func.func @transform_2(%arg0: i32) -> (i32, i32, i32) {
    %c0_i32 = arith.constant 0 : i32
    %c0_i32_0 = arith.constant 0 : i32
    %c0_i32_1 = arith.constant 0 : i32
    return %c0_i32, %c0_i32_0, %arg0 : i32, i32, i32
  }
}

</mosaic_0001>

<bundles_post_ra>
// kernel: mul.1
= control target key start
LH: loop header
LB: loop body
LE: loop exit
PB: predicated region body
PF: predicated region fallthrough
CT: control target
= control target key end

     0   :  { %s56_s0 = inlined_call_operand.vmem [shape: f32[16,32], index: 0, kind: input, shape index: {}, may-alias: {0,1}]   ;;  %s57_s1 = inlined_call_operand.vmem [shape: f32[16,32], index: 1, kind: input, shape index: {}, may-alias: {0,1}]   ;;  %s58_s2 = inlined_call_operand.vmem [shape: f32[16,32], index: 2, kind: output, shape index: {}]  }
   0x1   :  { %v3_v0 = vld [vmem:[%s56_s0] sm:$0xff]  ;;  %v20_v2 = vld [vmem:[%s56_s0 + $0x8] sm:$0xff] }
   0x2   :  { %v4_v1 = vld [vmem:[%s57_s1] sm:$0xff]  ;;  %v21_v4 = vld [vmem:[%s57_s1 + $0x8] sm:$0xff] }
   0x3   :  { %v7_v3 = vmul.f32 %v4_v1, %v3_v0  ;;  %v16_v5 = vmul.f32 %v21_v4, %v20_v2 }
   0x5   :  { %9 = vst [vmem:[%s58_s2] sm:$0xff] %v7_v3  ;;  %22 = vst [vmem:[%s58_s2 + $0x8] sm:$0xff] %v16_v5 }

// kernel: routing_layer_forward.1
= control target key start
LH: loop header
LB: loop body
LE: loop exit
PB: predicated region body
PF: predicated region fallthrough
CT: control target
= control target key end

     0   :  { %s1003_s0 = inlined_call_operand.vmem [shape: bf16[4,4,8,128], index: 0, kind: input, shape index: {}]   ;;  %s1004_s1 = inlined_call_operand.vmem [shape: bf16[4,8,128], index: 1, kind: input, shape index: {}]   ;;  %s1005_s2 = inlined_call_operand.vmem [shape: f32[4,8,128], index: 2, kind: output, shape index: {}]  }
   0x1   :  { %v599_v0 = vld [vmem:[%s1003_s0] sm:$0xff]   ;;  %v631_v1 = vld [vmem:[%s1003_s0 + $0x8] sm:$0xff]   ;;  %v632_v2 = vld [vmem:[%s1003_s0 + $0x10] sm:$0xff]  }
   0x2   :  { %v633_v3 = vld [vmem:[%s1003_s0 + $0x18] sm:$0xff]   ;;  %v761_v4 = vunpack.c.l.bf16 %v599_v0  ;;  %v763_v5 = vunpack.c.h.bf16 %v599_v0  ;;  %v765_v6 = vunpack.c.l.bf16 %v631_v1  ;;  %v767_v7 = vunpack.c.h.bf16 %v631_v1  ;;  %v634_v8 = vld [vmem:[%s1003_s0 + $0x20] sm:$0xff]   ;;  %v635_v9 = vld [vmem:[%s1003_s0 + $0x28] sm:$0xff]  }
   0x3   :  { %v775_v10 = vunpack.c.l.bf16 %v632_v2  ;;  %v777_v11 = vunpack.c.h.bf16 %v632_v2  ;;  %v779_v12 = vunpack.c.l.bf16 %v633_v3  ;;  %v781_v13 = vunpack.c.h.bf16 %v633_v3  ;;  %v636_v14 = vld [vmem:[%s1003_s0 + $0x30] sm:$0xff]   ;;  %v637_v15 = vld [vmem:[%s1003_s0 + $0x38] sm:$0xff]   ;;  %v591_v20 = vld [vmem:[%s1004_s1] sm:$0xff]  }
   0x4   :  { %v789_v16 = vunpack.c.l.bf16 %v634_v8  ;;  %v791_v17 = vunpack.c.h.bf16 %v634_v8  ;;  %v793_v18 = vunpack.c.l.bf16 %v635_v9  ;;  %v795_v19 = vunpack.c.h.bf16 %v635_v9  ;;  %v630_v21 = vld [vmem:[%s1004_s1 + $0x8] sm:$0xff]  }
   0x5   :  { %v36_v22 = vadd.f32 %v775_v10, %v761_v4  ;;  %v37_v23 = vadd.f32 %v777_v11, %v763_v5  ;;  %v38_v24 = vadd.f32 %v779_v12, %v765_v6  ;;  %v39_v25 = vadd.f32 %v781_v13, %v767_v7 }
   0x6   :  { %v811_v26 = vunpack.c.l.bf16 %v636_v14  ;;  %v813_v27 = vunpack.c.h.bf16 %v636_v14  ;;  %v815_v28 = vunpack.c.l.bf16 %v637_v15  ;;  %v817_v29 = vunpack.c.h.bf16 %v637_v15 }
   0x7   :  { %v49_v30 = vadd.f32 %v789_v16, %v36_v22  ;;  %v50_v31 = vadd.f32 %v791_v17, %v37_v23  ;;  %v51_v32 = vadd.f32 %v793_v18, %v38_v24  ;;  %v52_v33 = vadd.f32 %v795_v19, %v39_v25 }
   0x8   :  { %v823_v34 = vunpack.c.l.bf16 %v591_v20  ;;  %v825_v35 = vunpack.c.h.bf16 %v591_v20  ;;  %v827_v36 = vunpack.c.l.bf16 %v630_v21  ;;  %v829_v37 = vunpack.c.h.bf16 %v630_v21 }
   0x9   :  { %v62_v38 = vadd.f32 %v811_v26, %v49_v30  ;;  %v63_v39 = vadd.f32 %v813_v27, %v50_v31  ;;  %v64_v40 = vadd.f32 %v815_v28, %v51_v32  ;;  %v65_v41 = vadd.f32 %v817_v29, %v52_v33 }
   0xb   :  { %v66_v42 = vmul.f32 0.25, %v62_v38  ;;  %v67_v43 = vmul.f32 0.25, %v63_v39  ;;  %v68_v44 = vmul.f32 0.25, %v64_v40  ;;  %v69_v45 = vmul.f32 0.25, %v65_v41 }
   0xd   :  { %v70_v46 = vadd.f32 %v823_v34, %v66_v42  ;;  %v71_v47 = vadd.f32 %v825_v35, %v67_v43  ;;  %v72_v48 = vadd.f32 %v827_v36, %v68_v44  ;;  %v73_v49 = vadd.f32 %v829_v37, %v69_v45 }
   0xf   :  { %v74_v50 = vmul.f32 %v70_v46, %v70_v46  ;;  %v75_v51 = vmul.f32 %v71_v47, %v71_v47  ;;  %v76_v52 = vmul.f32 %v72_v48, %v72_v48  ;;  %v77_v53 = vmul.f32 %v73_v49, %v73_v49 }
  0x11   :  { %v78_v54 = vrot.slane %v74_v50, 4  ;;  %v84_v55 = vrot.slane %v75_v51, 4  ;;  %v90_v56 = vrot.slane %v76_v52, 4  ;;  %v96_v57 = vrot.slane %v77_v53, 4 }
  0x13   :  { %v79_v58 = vadd.f32 %v78_v54, %v74_v50  ;;  %v85_v59 = vadd.f32 %v84_v55, %v75_v51  ;;  %v91_v60 = vadd.f32 %v90_v56, %v76_v52  ;;  %v97_v61 = vadd.f32 %v96_v57, %v77_v53 }
  0x15   :  { %v80_v62 = vrot.slane %v79_v58, 2  ;;  %v86_v63 = vrot.slane %v85_v59, 2  ;;  %v92_v0 = vrot.slane %v91_v60, 2  ;;  %v98_v1 = vrot.slane %v97_v61, 2 }
  0x17   :  { %v81_v2 = vadd.f32 %v80_v62, %v79_v58  ;;  %v87_v3 = vadd.f32 %v86_v63, %v85_v59  ;;  %v93_v8 = vadd.f32 %v92_v0, %v91_v60  ;;  %v99_v9 = vadd.f32 %v98_v1, %v97_v61 }
  0x19   :  { %v82_v14 = vrot.slane %v81_v2, 1  ;;  %v88_v15 = vrot.slane %v87_v3, 1  ;;  %v94_v20 = vrot.slane %v93_v8, 1  ;;  %v100_v21 = vrot.slane %v99_v9, 1 }
  0x1b   :  { %v83_v22 = vadd.f32 %v82_v14, %v81_v2  ;;  %v89_v23 = vadd.f32 %v88_v15, %v87_v3  ;;  %v95_v24 = vadd.f32 %v94_v20, %v93_v8  ;;  %v101_v25 = vadd.f32 %v100_v21, %v99_v9 }
  0x1d   :  { %v102_v30 = vmax.f32 %v83_v22, 1e-24  ;;  %v103_v31 = vmax.f32 %v89_v23, 1e-24  ;;  %v104_v32 = vmax.f32 %v95_v24, 1e-24 }
  0x1e   :  { %v105_v33 = vmax.f32 %v101_v25, 1e-24 }
  0x1f   :  { %638 = vrsqrt.f32 %v102_v30 }
  0x20   :  { %640 = vrsqrt.f32 %v103_v31 }
  0x21   :  { %642 = vrsqrt.f32 %v104_v32 }
  0x22   :  { %644 = vrsqrt.f32 %v105_v33 }
  0x29   :  { %v639_v38 = vpop.eup %638 }
  0x2a   :  { %v641_v39 = vpop.eup %640  ;;  %v839_v40 = vmul.f32 %v639_v38, %v70_v46 }
  0x2b   :  { %v643_v41 = vpop.eup %642  ;;  %v841_v42 = vmul.f32 %v641_v39, %v71_v47 }
  0x2c   :  { %v645_v43 = vpop.eup %644  ;;  %v843_v44 = vmul.f32 %v643_v41, %v72_v48  ;;  %v114_v45 = vmul.f32 %v761_v4, %v839_v40  ;;  %v166_v50 = vmul.f32 %v775_v10, %v839_v40  ;;  %v851_v51 = vmul.f32 %v789_v16, %v839_v40 }
  0x2d   :  { %v853_v52 = vmul.f32 %v645_v43, %v73_v49  ;;  %v115_v46 = vmul.f32 %v763_v5, %v841_v42  ;;  %v167_v47 = vmul.f32 %v777_v11, %v841_v42  ;;  %v861_v48 = vmul.f32 %v791_v17, %v841_v42 }
  0x2e   :  { %v116_v53 = vmul.f32 %v765_v6, %v843_v44  ;;  %v118_v54 = vrot.slane %v114_v45, 4  ;;  %v168_v55 = vmul.f32 %v779_v12, %v843_v44  ;;  %v170_v56 = vrot.slane %v166_v50, 4 }
  0x2f   :  { %v117_v49 = vmul.f32 %v767_v7, %v853_v52  ;;  %v124_v57 = vrot.slane %v115_v46, 4  ;;  %v169_v58 = vmul.f32 %v781_v13, %v853_v52  ;;  %v176_v59 = vrot.slane %v167_v47, 4 }
  0x30   :  { %v119_v60 = vadd.f32 %v118_v54, %v114_v45  ;;  %v130_v61 = vrot.slane %v116_v53, 4  ;;  %v171_v62 = vadd.f32 %v170_v56, %v166_v50  ;;  %v182_v63 = vrot.slane %v168_v55, 4 }
  0x31   :  { %v125_v0 = vadd.f32 %v124_v57, %v115_v46  ;;  %v136_v1 = vrot.slane %v117_v49, 4  ;;  %v177_v2 = vadd.f32 %v176_v59, %v167_v47  ;;  %v188_v3 = vrot.slane %v169_v58, 4 }
  0x32   :  { %v120_v8 = vrot.slane %v119_v60, 2  ;;  %v131_v9 = vadd.f32 %v130_v61, %v116_v53  ;;  %v172_v14 = vrot.slane %v171_v62, 2  ;;  %v183_v15 = vadd.f32 %v182_v63, %v168_v55 }
  0x33   :  { %v126_v20 = vrot.slane %v125_v0, 2  ;;  %v137_v21 = vadd.f32 %v136_v1, %v117_v49  ;;  %v178_v22 = vrot.slane %v177_v2, 2  ;;  %v189_v23 = vadd.f32 %v188_v3, %v169_v58 }
  0x34   :  { %v121_v24 = vadd.f32 %v120_v8, %v119_v60  ;;  %v132_v25 = vrot.slane %v131_v9, 2  ;;  %v173_v30 = vadd.f32 %v172_v14, %v171_v62  ;;  %v184_v31 = vrot.slane %v183_v15, 2 }
  0x35   :  { %v127_v32 = vadd.f32 %v126_v20, %v125_v0  ;;  %v138_v33 = vrot.slane %v137_v21, 2  ;;  %v179_v38 = vadd.f32 %v178_v22, %v177_v2  ;;  %v190_v39 = vrot.slane %v189_v23, 2 }
  0x36   :  { %v122_v41 = vrot.slane %v121_v24, 1  ;;  %v133_v43 = vadd.f32 %v132_v25, %v131_v9  ;;  %v174_v45 = vrot.slane %v173_v30, 1  ;;  %v185_v50 = vadd.f32 %v184_v31, %v183_v15 }
  0x37   :  { %v128_v46 = vrot.slane %v127_v32, 1  ;;  %v139_v47 = vadd.f32 %v138_v33, %v137_v21  ;;  %v180_v53 = vrot.slane %v179_v38, 1  ;;  %v191_v54 = vadd.f32 %v190_v39, %v189_v23 }
  0x38   :  { %v123_v55 = vadd.f32 %v122_v41, %v121_v24  ;;  %v134_v56 = vrot.slane %v133_v43, 1  ;;  %v175_v49 = vadd.f32 %v174_v45, %v173_v30  ;;  %v186_v57 = vrot.slane %v185_v50, 1 }
  0x39   :  { %v129_v58 = vadd.f32 %v128_v46, %v127_v32  ;;  %v140_v59 = vrot.slane %v139_v47, 1  ;;  %v181_v60 = vadd.f32 %v180_v53, %v179_v38  ;;  %v192_v61 = vrot.slane %v191_v54, 1 }
  0x3a   :  { %v135_v62 = vadd.f32 %v134_v56, %v133_v43  ;;  %v142_v63 = vmul.f32 1.442695, %v123_v55  ;;  %v187_v0 = vadd.f32 %v186_v57, %v185_v50  ;;  %v194_v1 = vmul.f32 1.442695, %v175_v49 }
  0x3b   :  { %v141_v2 = vadd.f32 %v140_v59, %v139_v47  ;;  %v144_v3 = vmul.f32 1.442695, %v129_v58  ;;  %v193_v8 = vadd.f32 %v192_v61, %v191_v54  ;;  %v196_v9 = vmul.f32 1.442695, %v181_v60 }
  0x3c   :  { %646 = vpow2.f32 %v142_v63  ;;  %v146_v14 = vmul.f32 1.442695, %v135_v62  ;;  %v198_v15 = vmul.f32 1.442695, %v187_v0  ;;  %v220_v20 = vmul.f32 %v793_v18, %v843_v44 }
  0x3d   :  { %648 = vpow2.f32 %v144_v3  ;;  %v148_v21 = vmul.f32 1.442695, %v141_v2  ;;  %v200_v22 = vmul.f32 1.442695, %v193_v8  ;;  %v221_v23 = vmul.f32 %v795_v19, %v853_v52 }
  0x3e   :  { %650 = vpow2.f32 %v146_v14  ;;  %v222_v24 = vrot.slane %v851_v51, 4  ;;  %v228_v25 = vrot.slane %v861_v48, 4  ;;  %v234_v30 = vrot.slane %v220_v20, 4 }
  0x3f   :  { %652 = vpow2.f32 %v148_v21  ;;  %v240_v31 = vrot.slane %v221_v23, 4  ;;  %v270_v32 = vmul.f32 %v811_v26, %v839_v40  ;;  %v271_v33 = vmul.f32 %v813_v27, %v841_v42 }
  0x40   :  { %654 = vpow2.f32 %v194_v1  ;;  %v223_v38 = vadd.f32 %v222_v24, %v851_v51  ;;  %v229_v39 = vadd.f32 %v228_v25, %v861_v48  ;;  %v235_v41 = vadd.f32 %v234_v30, %v220_v20 }
  0x41   :  { %656 = vpow2.f32 %v196_v9  ;;  %v241_v43 = vadd.f32 %v240_v31, %v221_v23  ;;  %v272_v45 = vmul.f32 %v815_v28, %v843_v44  ;;  %v273_v50 = vmul.f32 %v817_v29, %v853_v52 }
  0x42   :  { %658 = vpow2.f32 %v198_v15  ;;  %v224_v46 = vrot.slane %v223_v38, 2  ;;  %v230_v40 = vrot.slane %v229_v39, 2  ;;  %v236_v47 = vrot.slane %v235_v41, 2 }
  0x43   :  { %660 = vpow2.f32 %v200_v22  ;;  %v242_v42 = vrot.slane %v241_v43, 2  ;;  %v274_v53 = vrot.slane %v270_v32, 4  ;;  %v280_v54 = vrot.slane %v271_v33, 4 }
  0x44   :  { %v225_v51 = vadd.f32 %v224_v46, %v223_v38  ;;  %v231_v55 = vadd.f32 %v230_v40, %v229_v39  ;;  %v237_v48 = vadd.f32 %v236_v47, %v235_v41  ;;  %v286_v56 = vrot.slane %v272_v45, 4 }
  0x45   :  { %v243_v49 = vadd.f32 %v242_v42, %v241_v43  ;;  %v275_v57 = vadd.f32 %v274_v53, %v270_v32  ;;  %v281_v58 = vadd.f32 %v280_v54, %v271_v33  ;;  %v292_v59 = vrot.slane %v273_v50, 4 }
  0x46   :  { %v887_v44 = vpop.eup %646  ;;  %v226_v60 = vrot.slane %v225_v51, 1  ;;  %v232_v52 = vrot.slane %v231_v55, 1  ;;  %v238_v61 = vrot.slane %v237_v48, 1  ;;  %v287_v62 = vadd.f32 %v286_v56, %v272_v45 }
  0x47   :  { %v889_v63 = vpop.eup %648  ;;  %v244_v0 = vrot.slane %v243_v49, 1  ;;  %v276_v1 = vrot.slane %v275_v57, 2  ;;  %v282_v2 = vrot.slane %v281_v58, 2  ;;  %v293_v3 = vadd.f32 %v292_v59, %v273_v50 }
  0x48   :  { %v651_v8 = vpop.eup %650  ;;  %v150_v9 = vadd.f32 %v889_v63, %v887_v44  ;;  %v227_v14 = vadd.f32 %v226_v60, %v225_v51  ;;  %v233_v15 = vadd.f32 %v232_v52, %v231_v55  ;;  %v239_v20 = vadd.f32 %v238_v61, %v237_v48 }
  0x49   :  { %v653_v21 = vpop.eup %652  ;;  %v245_v22 = vadd.f32 %v244_v0, %v243_v49  ;;  %v277_v23 = vadd.f32 %v276_v1, %v275_v57  ;;  %v283_v24 = vadd.f32 %v282_v2, %v281_v58  ;;  %v288_v25 = vrot.slane %v287_v62, 2 }
  0x4a   :  { %v655_v30 = vpop.eup %654  ;;  %v151_v31 = vadd.f32 %v651_v8, %v150_v9  ;;  %v246_v32 = vmul.f32 1.442695, %v227_v14  ;;  %v248_v33 = vmul.f32 1.442695, %v233_v15  ;;  %v250_v38 = vmul.f32 1.442695, %v239_v20 }
  0x4b   :  { %v657_v39 = vpop.eup %656  ;;  %v252_v41 = vmul.f32 1.442695, %v245_v22  ;;  %v278_v43 = vrot.slane %v277_v23, 1  ;;  %v284_v45 = vrot.slane %v283_v24, 1  ;;  %v289_v50 = vadd.f32 %v288_v25, %v287_v62 }
  0x4c   :  { %v659_v46 = vpop.eup %658  ;;  %v152_v40 = vadd.f32 %v653_v21, %v151_v31  ;;  %v202_v47 = vadd.f32 %v657_v39, %v655_v30  ;;  %662 = vpow2.f32 %v246_v32  ;;  %v294_v42 = vrot.slane %v293_v3, 2 }
  0x4d   :  { %v661_v53 = vpop.eup %660  ;;  %664 = vpow2.f32 %v248_v33  ;;  %v279_v54 = vadd.f32 %v278_v43, %v277_v23  ;;  %v285_v51 = vadd.f32 %v284_v45, %v283_v24  ;;  %v290_v55 = vrot.slane %v289_v50, 1 }
  0x4e   :  { %666 = vrcp.f32 %v152_v40  ;;  %v203_v48 = vadd.f32 %v659_v46, %v202_v47  ;;  %v295_v56 = vadd.f32 %v294_v42, %v293_v3 }
  0x4f   :  { %668 = vpow2.f32 %v250_v38  ;;  %v291_v49 = vadd.f32 %v290_v55, %v289_v50  ;;  %v298_v57 = vmul.f32 1.442695, %v279_v54  ;;  %v300_v58 = vmul.f32 1.442695, %v285_v51 }
  0x50   :  { %670 = vpow2.f32 %v252_v41  ;;  %v296_v59 = vrot.slane %v295_v56, 1  ;;  %v204_v60 = vadd.f32 %v661_v53, %v203_v48 }
  0x51   :  { %v302_v52 = vmul.f32 1.442695, %v291_v49  ;;  %672 = vpow2.f32 %v298_v57 }
  0x52   :  { %v297_v61 = vadd.f32 %v296_v59, %v295_v56  ;;  %674 = vpow2.f32 %v300_v58 }
  0x53   :  { %676 = vpow2.f32 %v302_v52 }
  0x54   :  { %v304_v62 = vmul.f32 1.442695, %v297_v61  ;;  %678 = vrcp.f32 %v204_v60 }
  0x56   :  { %v663_v0 = vpop.eup %662  ;;  %680 = vpow2.f32 %v304_v62 }
  0x57   :  { %v665_v1 = vpop.eup %664 }
  0x58   :  { %v667_v2 = vpop.eup %666  ;;  %v254_v9 = vadd.f32 %v665_v1, %v663_v0 }
  0x59   :  { %v669_v3 = vpop.eup %668  ;;  %v154_v24 = vmul.f32 %v667_v2, %v887_v44  ;;  %v155_v31 = vmul.f32 %v667_v2, %v889_v63  ;;  %v156_v32 = vmul.f32 %v667_v2, %v651_v8  ;;  %v157_v33 = vmul.f32 %v667_v2, %v653_v21 }
  0x5a   :  { %v671_v14 = vpop.eup %670  ;;  %v255_v15 = vadd.f32 %v669_v3, %v254_v9 }
  0x5b   :  { %v673_v20 = vpop.eup %672  ;;  %v158_v45 = vmul.f32 %v761_v4, %v154_v24  ;;  %v159_v40 = vmul.f32 %v763_v5, %v155_v31  ;;  %v160_v47 = vmul.f32 %v765_v6, %v156_v32  ;;  %v161_v42 = vmul.f32 %v767_v7, %v157_v33 }
  0x5c   :  { %v256_v22 = vadd.f32 %v671_v14, %v255_v15  ;;  %v675_v23 = vpop.eup %674 }
  0x5d   :  { %v677_v25 = vpop.eup %676  ;;  %v306_v41 = vadd.f32 %v675_v23, %v673_v20  ;;  %v162_v8 = vadd.f32 %v823_v34, %v158_v45  ;;  %v163_v21 = vadd.f32 %v825_v35, %v159_v40  ;;  %v164_v48 = vadd.f32 %v827_v36, %v160_v47 }
  0x5e   :  { %v679_v38 = vpop.eup %678  ;;  %682 = vrcp.f32 %v256_v22  ;;  %v165_v56 = vadd.f32 %v829_v37, %v161_v42 }
  0x5f   :  { %v307_v50 = vadd.f32 %v677_v25, %v306_v41  ;;  %v206_v54 = vmul.f32 %v679_v38, %v655_v30  ;;  %v207_v44 = vmul.f32 %v679_v38, %v657_v39  ;;  %v208_v51 = vmul.f32 %v679_v38, %v659_v46 }
  0x60   :  { %v681_v43 = vpop.eup %680  ;;  %v209_v55 = vmul.f32 %v679_v38, %v661_v53 }
  0x61   :  { %v308_v63 = vadd.f32 %v681_v43, %v307_v50  ;;  %v210_v49 = vmul.f32 %v775_v10, %v206_v54  ;;  %v211_v57 = vmul.f32 %v777_v11, %v207_v44  ;;  %v212_v58 = vmul.f32 %v779_v12, %v208_v51 }
  0x62   :  { %v213_v30 = vmul.f32 %v781_v13, %v209_v55 }
  0x63   :  { %684 = vrcp.f32 %v308_v63  ;;  %v214_v52 = vadd.f32 %v210_v49, %v162_v8  ;;  %v215_v61 = vadd.f32 %v211_v57, %v163_v21  ;;  %v216_v62 = vadd.f32 %v212_v58, %v164_v48 }
  0x64   :  { %v217_v2 = vadd.f32 %v213_v30, %v165_v56 }
  0x68   :  { %v683_v39 = vpop.eup %682 }
  0x69   :  { %v258_v46 = vmul.f32 %v683_v39, %v663_v0  ;;  %v259_v53 = vmul.f32 %v683_v39, %v665_v1  ;;  %v260_v59 = vmul.f32 %v683_v39, %v669_v3  ;;  %v261_v60 = vmul.f32 %v683_v39, %v671_v14 }
  0x6b   :  { %v262_v9 = vmul.f32 %v789_v16, %v258_v46  ;;  %v263_v15 = vmul.f32 %v791_v17, %v259_v53  ;;  %v264_v22 = vmul.f32 %v793_v18, %v260_v59  ;;  %v265_v24 = vmul.f32 %v795_v19, %v261_v60 }
  0x6d   :  { %v685_v31 = vpop.eup %684  ;;  %v266_v32 = vadd.f32 %v262_v9, %v214_v52  ;;  %v267_v33 = vadd.f32 %v263_v15, %v215_v61  ;;  %v268_v38 = vadd.f32 %v264_v22, %v216_v62  ;;  %v269_v0 = vadd.f32 %v265_v24, %v217_v2 }
  0x6e   :  { %v310_v1 = vmul.f32 %v685_v31, %v673_v20  ;;  %v311_v3 = vmul.f32 %v685_v31, %v675_v23  ;;  %v312_v14 = vmul.f32 %v685_v31, %v677_v25  ;;  %v313_v41 = vmul.f32 %v685_v31, %v681_v43 }
  0x70   :  { %v314_v45 = vmul.f32 %v811_v26, %v310_v1  ;;  %v315_v50 = vmul.f32 %v813_v27, %v311_v3  ;;  %v316_v40 = vmul.f32 %v815_v28, %v312_v14  ;;  %v317_v47 = vmul.f32 %v817_v29, %v313_v41 }
  0x72   :  { %v318_v42 = vadd.f32 %v314_v45, %v266_v32  ;;  %v319_v54 = vadd.f32 %v315_v50, %v267_v33  ;;  %v320_v44 = vadd.f32 %v316_v40, %v268_v38  ;;  %v321_v51 = vadd.f32 %v317_v47, %v269_v0 }
  0x74   :  { %v322_v55 = vmul.f32 %v318_v42, %v318_v42  ;;  %v323_v63 = vmul.f32 %v319_v54, %v319_v54  ;;  %v324_v8 = vmul.f32 %v320_v44, %v320_v44  ;;  %v325_v21 = vmul.f32 %v321_v51, %v321_v51 }
  0x76   :  { %v326_v20 = vrot.slane %v322_v55, 4  ;;  %v332_v23 = vrot.slane %v323_v63, 4  ;;  %v338_v25 = vrot.slane %v324_v8, 4  ;;  %v344_v43 = vrot.slane %v325_v21, 4 }
  0x78   :  { %v327_v48 = vadd.f32 %v326_v20, %v322_v55  ;;  %v333_v56 = vadd.f32 %v332_v23, %v323_v63  ;;  %v339_v49 = vadd.f32 %v338_v25, %v324_v8  ;;  %v345_v57 = vadd.f32 %v344_v43, %v325_v21 }
  0x7a   :  { %v328_v58 = vrot.slane %v327_v48, 2  ;;  %v334_v30 = vrot.slane %v333_v56, 2  ;;  %v340_v39 = vrot.slane %v339_v49, 2  ;;  %v346_v46 = vrot.slane %v345_v57, 2 }
  0x7c   :  { %v329_v53 = vadd.f32 %v328_v58, %v327_v48  ;;  %v335_v59 = vadd.f32 %v334_v30, %v333_v56  ;;  %v341_v60 = vadd.f32 %v340_v39, %v339_v49  ;;  %v347_v52 = vadd.f32 %v346_v46, %v345_v57 }
  0x7e   :  { %v330_v61 = vrot.slane %v329_v53, 1  ;;  %v336_v62 = vrot.slane %v335_v59, 1  ;;  %v342_v2 = vrot.slane %v341_v60, 1  ;;  %v348_v9 = vrot.slane %v347_v52, 1 }
  0x80   :  { %v331_v15 = vadd.f32 %v330_v61, %v329_v53  ;;  %v337_v22 = vadd.f32 %v336_v62, %v335_v59  ;;  %v343_v24 = vadd.f32 %v342_v2, %v341_v60  ;;  %v349_v31 = vadd.f32 %v348_v9, %v347_v52 }
  0x82   :  { %v350_v32 = vmax.f32 %v331_v15, 1e-24  ;;  %v351_v33 = vmax.f32 %v337_v22, 1e-24  ;;  %v352_v38 = vmax.f32 %v343_v24, 1e-24 }
  0x83   :  { %v353_v0 = vmax.f32 %v349_v31, 1e-24 }
  0x84   :  { %686 = vrsqrt.f32 %v350_v32 }
  0x85   :  { %688 = vrsqrt.f32 %v351_v33 }
  0x86   :  { %690 = vrsqrt.f32 %v352_v38 }
  0x87   :  { %692 = vrsqrt.f32 %v353_v0 }
  0x8e   :  { %v687_v1 = vpop.eup %686 }
  0x8f   :  { %v689_v3 = vpop.eup %688  ;;  %v915_v14 = vmul.f32 %v687_v1, %v318_v42 }
  0x90   :  { %v691_v41 = vpop.eup %690  ;;  %v917_v45 = vmul.f32 %v689_v3, %v319_v54 }
  0x91   :  { %v693_v50 = vpop.eup %692  ;;  %v919_v40 = vmul.f32 %v691_v41, %v320_v44  ;;  %v362_v47 = vmul.f32 %v761_v4, %v915_v14  ;;  %v414_v55 = vmul.f32 %v775_v10, %v915_v14  ;;  %v927_v63 = vmul.f32 %v789_v16, %v915_v14 }
  0x92   :  { %v929_v8 = vmul.f32 %v693_v50, %v321_v51  ;;  %v363_v42 = vmul.f32 %v763_v5, %v917_v45  ;;  %v415_v54 = vmul.f32 %v777_v11, %v917_v45  ;;  %v937_v44 = vmul.f32 %v791_v17, %v917_v45 }
  0x93   :  { %v364_v21 = vmul.f32 %v765_v6, %v919_v40  ;;  %v366_v20 = vrot.slane %v362_v47, 4  ;;  %v416_v23 = vmul.f32 %v779_v12, %v919_v40  ;;  %v418_v25 = vrot.slane %v414_v55, 4 }
  0x94   :  { %v365_v51 = vmul.f32 %v767_v7, %v929_v8  ;;  %v372_v43 = vrot.slane %v363_v42, 4  ;;  %v417_v48 = vmul.f32 %v781_v13, %v929_v8  ;;  %v424_v56 = vrot.slane %v415_v54, 4 }
  0x95   :  { %v367_v49 = vadd.f32 %v366_v20, %v362_v47  ;;  %v378_v57 = vrot.slane %v364_v21, 4  ;;  %v419_v58 = vadd.f32 %v418_v25, %v414_v55  ;;  %v430_v30 = vrot.slane %v416_v23, 4 }
  0x96   :  { %v373_v39 = vadd.f32 %v372_v43, %v363_v42  ;;  %v384_v46 = vrot.slane %v365_v51, 4  ;;  %v425_v53 = vadd.f32 %v424_v56, %v415_v54  ;;  %v436_v59 = vrot.slane %v417_v48, 4 }
  0x97   :  { %v368_v60 = vrot.slane %v367_v49, 2  ;;  %v379_v52 = vadd.f32 %v378_v57, %v364_v21  ;;  %v420_v61 = vrot.slane %v419_v58, 2  ;;  %v431_v62 = vadd.f32 %v430_v30, %v416_v23 }
  0x98   :  { %v374_v2 = vrot.slane %v373_v39, 2  ;;  %v385_v9 = vadd.f32 %v384_v46, %v365_v51  ;;  %v426_v15 = vrot.slane %v425_v53, 2  ;;  %v437_v22 = vadd.f32 %v436_v59, %v417_v48 }
  0x99   :  { %v369_v24 = vadd.f32 %v368_v60, %v367_v49  ;;  %v380_v31 = vrot.slane %v379_v52, 2  ;;  %v421_v32 = vadd.f32 %v420_v61, %v419_v58  ;;  %v432_v33 = vrot.slane %v431_v62, 2 }
  0x9a   :  { %v375_v38 = vadd.f32 %v374_v2, %v373_v39  ;;  %v386_v0 = vrot.slane %v385_v9, 2  ;;  %v427_v1 = vadd.f32 %v426_v15, %v425_v53  ;;  %v438_v3 = vrot.slane %v437_v22, 2 }
  0x9b   :  { %v370_v41 = vrot.slane %v369_v24, 1  ;;  %v381_v50 = vadd.f32 %v380_v31, %v379_v52  ;;  %v422_v47 = vrot.slane %v421_v32, 1  ;;  %v433_v55 = vadd.f32 %v432_v33, %v431_v62 }
  0x9c   :  { %v376_v42 = vrot.slane %v375_v38, 1  ;;  %v387_v54 = vadd.f32 %v386_v0, %v385_v9  ;;  %v428_v21 = vrot.slane %v427_v1, 1  ;;  %v439_v20 = vadd.f32 %v438_v3, %v437_v22 }
  0x9d   :  { %v371_v23 = vadd.f32 %v370_v41, %v369_v24  ;;  %v382_v25 = vrot.slane %v381_v50, 1  ;;  %v423_v51 = vadd.f32 %v422_v47, %v421_v32  ;;  %v434_v43 = vrot.slane %v433_v55, 1 }
  0x9e   :  { %v377_v48 = vadd.f32 %v376_v42, %v375_v38  ;;  %v388_v56 = vrot.slane %v387_v54, 1  ;;  %v429_v49 = vadd.f32 %v428_v21, %v427_v1  ;;  %v440_v57 = vrot.slane %v439_v20, 1 }
  0x9f   :  { %v383_v58 = vadd.f32 %v382_v25, %v381_v50  ;;  %v390_v30 = vmul.f32 1.442695, %v371_v23  ;;  %v435_v39 = vadd.f32 %v434_v43, %v433_v55  ;;  %v442_v46 = vmul.f32 1.442695, %v423_v51 }
  0xa0   :  { %v389_v53 = vadd.f32 %v388_v56, %v387_v54  ;;  %v392_v59 = vmul.f32 1.442695, %v377_v48  ;;  %v441_v60 = vadd.f32 %v440_v57, %v439_v20  ;;  %v444_v52 = vmul.f32 1.442695, %v429_v49 }
  0xa1   :  { %694 = vpow2.f32 %v390_v30  ;;  %v394_v61 = vmul.f32 1.442695, %v383_v58  ;;  %v446_v62 = vmul.f32 1.442695, %v435_v39  ;;  %v468_v2 = vmul.f32 %v793_v18, %v919_v40 }
  0xa2   :  { %696 = vpow2.f32 %v392_v59  ;;  %v396_v9 = vmul.f32 1.442695, %v389_v53  ;;  %v448_v15 = vmul.f32 1.442695, %v441_v60  ;;  %v469_v22 = vmul.f32 %v795_v19, %v929_v8 }
  0xa3   :  { %698 = vpow2.f32 %v394_v61  ;;  %v470_v24 = vrot.slane %v927_v63, 4  ;;  %v476_v31 = vrot.slane %v937_v44, 4  ;;  %v482_v32 = vrot.slane %v468_v2, 4 }
  0xa4   :  { %700 = vpow2.f32 %v396_v9  ;;  %v488_v33 = vrot.slane %v469_v22, 4  ;;  %v518_v38 = vmul.f32 %v811_v26, %v915_v14  ;;  %v519_v0 = vmul.f32 %v813_v27, %v917_v45 }
  0xa5   :  { %702 = vpow2.f32 %v442_v46  ;;  %v471_v1 = vadd.f32 %v470_v24, %v927_v63  ;;  %v477_v3 = vadd.f32 %v476_v31, %v937_v44  ;;  %v483_v41 = vadd.f32 %v482_v32, %v468_v2 }
  0xa6   :  { %704 = vpow2.f32 %v444_v52  ;;  %v489_v50 = vadd.f32 %v488_v33, %v469_v22  ;;  %v520_v47 = vmul.f32 %v815_v28, %v919_v40  ;;  %v521_v55 = vmul.f32 %v817_v29, %v929_v8 }
  0xa7   :  { %706 = vpow2.f32 %v446_v62  ;;  %v472_v42 = vrot.slane %v471_v1, 2  ;;  %v478_v14 = vrot.slane %v477_v3, 2  ;;  %v484_v54 = vrot.slane %v483_v41, 2 }
  0xa8   :  { %708 = vpow2.f32 %v448_v15  ;;  %v490_v45 = vrot.slane %v489_v50, 2  ;;  %v522_v21 = vrot.slane %v518_v38, 4  ;;  %v528_v20 = vrot.slane %v519_v0, 4 }
  0xa9   :  { %v473_v63 = vadd.f32 %v472_v42, %v471_v1  ;;  %v479_v23 = vadd.f32 %v478_v14, %v477_v3  ;;  %v485_v44 = vadd.f32 %v484_v54, %v483_v41  ;;  %v534_v25 = vrot.slane %v520_v47, 4 }
  0xaa   :  { %v491_v51 = vadd.f32 %v490_v45, %v489_v50  ;;  %v523_v43 = vadd.f32 %v522_v21, %v518_v38  ;;  %v529_v48 = vadd.f32 %v528_v20, %v519_v0  ;;  %v540_v56 = vrot.slane %v521_v55, 4 }
  0xab   :  { %v963_v40 = vpop.eup %694  ;;  %v474_v49 = vrot.slane %v473_v63, 1  ;;  %v480_v8 = vrot.slane %v479_v23, 1  ;;  %v486_v57 = vrot.slane %v485_v44, 1  ;;  %v535_v58 = vadd.f32 %v534_v25, %v520_v47 }
  0xac   :  { %v965_v30 = vpop.eup %696  ;;  %v492_v39 = vrot.slane %v491_v51, 1  ;;  %v524_v46 = vrot.slane %v523_v43, 2  ;;  %v530_v53 = vrot.slane %v529_v48, 2  ;;  %v541_v59 = vadd.f32 %v540_v56, %v521_v55 }
  0xad   :  { %v699_v60 = vpop.eup %698  ;;  %v398_v52 = vadd.f32 %v965_v30, %v963_v40  ;;  %v475_v61 = vadd.f32 %v474_v49, %v473_v63  ;;  %v481_v62 = vadd.f32 %v480_v8, %v479_v23  ;;  %v487_v2 = vadd.f32 %v486_v57, %v485_v44 }
  0xae   :  { %v701_v9 = vpop.eup %700  ;;  %v493_v15 = vadd.f32 %v492_v39, %v491_v51  ;;  %v525_v22 = vadd.f32 %v524_v46, %v523_v43  ;;  %v531_v24 = vadd.f32 %v530_v53, %v529_v48  ;;  %v536_v31 = vrot.slane %v535_v58, 2 }
  0xaf   :  { %v703_v32 = vpop.eup %702  ;;  %v399_v33 = vadd.f32 %v699_v60, %v398_v52  ;;  %v494_v38 = vmul.f32 1.442695, %v475_v61  ;;  %v496_v0 = vmul.f32 1.442695, %v481_v62  ;;  %v498_v1 = vmul.f32 1.442695, %v487_v2 }
  0xb0   :  { %v705_v3 = vpop.eup %704  ;;  %v500_v41 = vmul.f32 1.442695, %v493_v15  ;;  %v526_v50 = vrot.slane %v525_v22, 1  ;;  %v532_v47 = vrot.slane %v531_v24, 1  ;;  %v537_v55 = vadd.f32 %v536_v31, %v535_v58 }
  0xb1   :  { %v707_v42 = vpop.eup %706  ;;  %v400_v14 = vadd.f32 %v701_v9, %v399_v33  ;;  %v450_v54 = vadd.f32 %v705_v3, %v703_v32  ;;  %710 = vpow2.f32 %v494_v38  ;;  %v542_v45 = vrot.slane %v541_v59, 2 }
  0xb2   :  { %v709_v21 = vpop.eup %708  ;;  %712 = vpow2.f32 %v496_v0  ;;  %v527_v20 = vadd.f32 %v526_v50, %v525_v22  ;;  %v533_v63 = vadd.f32 %v532_v47, %v531_v24  ;;  %v538_v23 = vrot.slane %v537_v55, 1 }
  0xb3   :  { %714 = vrcp.f32 %v400_v14  ;;  %v451_v44 = vadd.f32 %v707_v42, %v450_v54  ;;  %v543_v25 = vadd.f32 %v542_v45, %v541_v59 }
  0xb4   :  { %716 = vpow2.f32 %v498_v1  ;;  %v539_v51 = vadd.f32 %v538_v23, %v537_v55  ;;  %v546_v43 = vmul.f32 1.442695, %v527_v20  ;;  %v548_v48 = vmul.f32 1.442695, %v533_v63 }
  0xb5   :  { %718 = vpow2.f32 %v500_v41  ;;  %v544_v56 = vrot.slane %v543_v25, 1  ;;  %v452_v49 = vadd.f32 %v709_v21, %v451_v44 }
  0xb6   :  { %v550_v8 = vmul.f32 1.442695, %v539_v51  ;;  %720 = vpow2.f32 %v546_v43 }
  0xb7   :  { %v545_v57 = vadd.f32 %v544_v56, %v543_v25  ;;  %722 = vpow2.f32 %v548_v48 }
  0xb8   :  { %724 = vpow2.f32 %v550_v8 }
  0xb9   :  { %v552_v58 = vmul.f32 1.442695, %v545_v57  ;;  %726 = vrcp.f32 %v452_v49 }
  0xbb   :  { %v711_v39 = vpop.eup %710  ;;  %728 = vpow2.f32 %v552_v58 }
  0xbc   :  { %v713_v46 = vpop.eup %712 }
  0xbd   :  { %v715_v53 = vpop.eup %714  ;;  %v502_v52 = vadd.f32 %v713_v46, %v711_v39 }
  0xbe   :  { %v717_v59 = vpop.eup %716  ;;  %v402_v24 = vmul.f32 %v715_v53, %v963_v40  ;;  %v403_v33 = vmul.f32 %v715_v53, %v965_v30  ;;  %v404_v38 = vmul.f32 %v715_v53, %v699_v60  ;;  %v405_v0 = vmul.f32 %v715_v53, %v701_v9 }
  0xbf   :  { %v719_v61 = vpop.eup %718  ;;  %v503_v62 = vadd.f32 %v717_v59, %v502_v52 }
  0xc0   :  { %v721_v2 = vpop.eup %720  ;;  %v406_v47 = vmul.f32 %v761_v4, %v402_v24  ;;  %v407_v14 = vmul.f32 %v763_v5, %v403_v33  ;;  %v408_v54 = vmul.f32 %v765_v6, %v404_v38  ;;  %v409_v45 = vmul.f32 %v767_v7, %v405_v0 }
  0xc1   :  { %v504_v15 = vadd.f32 %v719_v61, %v503_v62  ;;  %v723_v22 = vpop.eup %722 }
  0xc2   :  { %v725_v31 = vpop.eup %724  ;;  %v554_v41 = vadd.f32 %v723_v22, %v721_v2  ;;  %v410_v60 = vadd.f32 %v823_v34, %v406_v47  ;;  %v411_v9 = vadd.f32 %v825_v35, %v407_v14  ;;  %v412_v44 = vadd.f32 %v827_v36, %v408_v54 }
  0xc3   :  { %v727_v1 = vpop.eup %726  ;;  %730 = vrcp.f32 %v504_v15  ;;  %v413_v4 = vadd.f32 %v829_v37, %v409_v45 }
  0xc4   :  { %v555_v55 = vadd.f32 %v725_v31, %v554_v41  ;;  %v454_v20 = vmul.f32 %v727_v1, %v703_v32  ;;  %v455_v40 = vmul.f32 %v727_v1, %v705_v3  ;;  %v456_v63 = vmul.f32 %v727_v1, %v707_v42 }
  0xc5   :  { %v729_v50 = vpop.eup %728  ;;  %v457_v23 = vmul.f32 %v727_v1, %v709_v21 }
  0xc6   :  { %v556_v30 = vadd.f32 %v729_v50, %v555_v55  ;;  %v458_v5 = vmul.f32 %v775_v10, %v454_v20  ;;  %v459_v6 = vmul.f32 %v777_v11, %v455_v40  ;;  %v460_v7 = vmul.f32 %v779_v12, %v456_v63 }
  0xc7   :  { %v461_v32 = vmul.f32 %v781_v13, %v457_v23 }
  0xc8   :  { %732 = vrcp.f32 %v556_v30  ;;  %v462_v34 = vadd.f32 %v458_v5, %v410_v60  ;;  %v463_v43 = vadd.f32 %v459_v6, %v411_v9  ;;  %v464_v35 = vadd.f32 %v460_v7, %v412_v44 }
  0xc9   :  { %v465_v48 = vadd.f32 %v461_v32, %v413_v4 }
  0xcd   :  { %v731_v3 = vpop.eup %730 }
  0xce   :  { %v506_v42 = vmul.f32 %v731_v3, %v711_v39  ;;  %v507_v21 = vmul.f32 %v731_v3, %v713_v46  ;;  %v508_v25 = vmul.f32 %v731_v3, %v717_v59  ;;  %v509_v51 = vmul.f32 %v731_v3, %v719_v61 }
  0xd0   :  { %v510_v36 = vmul.f32 %v789_v16, %v506_v42  ;;  %v511_v37 = vmul.f32 %v791_v17, %v507_v21  ;;  %v512_v10 = vmul.f32 %v793_v18, %v508_v25  ;;  %v513_v11 = vmul.f32 %v795_v19, %v509_v51 }
  0xd2   :  { %v733_v12 = vpop.eup %732  ;;  %v514_v56 = vadd.f32 %v510_v36, %v462_v34  ;;  %v515_v13 = vadd.f32 %v511_v37, %v463_v43  ;;  %v516_v49 = vadd.f32 %v512_v10, %v464_v35  ;;  %v517_v8 = vadd.f32 %v513_v11, %v465_v48 }
  0xd3   :  { %v558_v57 = vmul.f32 %v733_v12, %v721_v2  ;;  %v559_v58 = vmul.f32 %v733_v12, %v723_v22  ;;  %v560_v39 = vmul.f32 %v733_v12, %v725_v31  ;;  %v561_v46 = vmul.f32 %v733_v12, %v729_v50 }
  0xd5   :  { %v562_v53 = vmul.f32 %v811_v26, %v558_v57  ;;  %v563_v52 = vmul.f32 %v813_v27, %v559_v58  ;;  %v564_v16 = vmul.f32 %v815_v28, %v560_v39  ;;  %v565_v17 = vmul.f32 %v817_v29, %v561_v46 }
  0xd7   :  { %v566_v18 = vadd.f32 %v562_v53, %v514_v56  ;;  %v567_v59 = vadd.f32 %v563_v52, %v515_v13  ;;  %v568_v19 = vadd.f32 %v564_v16, %v516_v49  ;;  %v569_v61 = vadd.f32 %v565_v17, %v517_v8 }
  0xd9   :  { %570 = vst [vmem:[%s1005_s2] sm:$0xff] %v566_v18  ;;  %571 = vst [vmem:[%s1005_s2 + $0x8] sm:$0xff] %v567_v59 }
  0xda   :  { %572 = vst [vmem:[%s1005_s2 + $0x10] sm:$0xff] %v568_v19  ;;  %573 = vst [vmem:[%s1005_s2 + $0x18] sm:$0xff] %v569_v61 }

</bundles_post_ra>
